<compile_context>
chip_gen: v5e
topology: v5e:2x2
jax: 0.10.0
libtpu: 0.0.40
codegen_flags: <defaults>
</compile_context>

<pallas_src>
import jax
import jax.numpy as jnp
from jax.experimental import pallas as pl
from jax.experimental.pallas import tpu as pltpu


# ----------------------------- kernels ---------------------------------------


def ffn_kernel_fused(x_ref, w1_ref, b1_ref, w2_ref, b2_ref, o_ref):
    # Single hidden chunk: x (tm, D), w1 (D, H), b1 (1, H), w2 (H, D), b2 (1, D).
    h = jnp.dot(x_ref[...], w1_ref[...], preferred_element_type=jnp.float32)
    h = jnp.maximum(h + b1_ref[...].astype(jnp.float32), 0.0)          # ReLU
    o_ref[...] = (jnp.dot(h.astype(w2_ref.dtype), w2_ref[...],
                          preferred_element_type=jnp.float32)
                  + b2_ref[...].astype(jnp.float32)).astype(o_ref.dtype)


def ffn_kernel_acc(x_ref, w1_ref, b1_ref, w2_ref, b2_ref, o_ref, acc_ref):
    # Hidden-tiled: acc_ref (tm, D) fp32 is resident across the inner (arbitrary) axis.
    k = pl.program_id(1)

    @pl.when(k == 0)
    def _():
        acc_ref[...] = jnp.zeros_like(acc_ref)

    h = jnp.dot(x_ref[...], w1_ref[...], preferred_element_type=jnp.float32)
    h = jnp.maximum(h + b1_ref[...].astype(jnp.float32), 0.0)          # ReLU
    acc_ref[...] += jnp.dot(h.astype(w2_ref.dtype), w2_ref[...],
                            preferred_element_type=jnp.float32)

    @pl.when(k == pl.num_programs(1) - 1)
    def _():
        # b2 is added exactly once, in the finalize branch.
        o_ref[...] = (acc_ref[...] + b2_ref[...].astype(jnp.float32)).astype(o_ref.dtype)


# ----------------------------- wrapper ----------------------------------------


def _round_up(x, m):
    return ((x + m - 1) // m) * m


def _tpu_hints():
    """(vmem_capacity_bytes, tensorcores_per_chip) with safe fallbacks."""
    kind = ""
    try:
        kind = (jax.devices()[0].device_kind or "").lower()
    except Exception:
        pass
    cores = 2 if "v7" in kind else 1
    try:
        vmem = int(pltpu.get_tpu_info().vmem_capacity_bytes)
    except Exception:
        # v7x: 64 MiB / TC; v4/v5e/v6e: 128 MiB. Unknown -> conservative.
        vmem = (64 << 20) if ("v7" in kind or not kind) else (128 << 20)
    return vmem, cores


def feed_forward(x, w1, b1, w2, b2, *, tm=None, th=None, compute_dtype=None,
                 vmem_limit_bytes=None):
    """x: (B, S, D). w1: (D, 4D), b1: (4D,), w2: (4D, D), b2: (D,)."""
    B, S, D = x.shape
    H = w1.shape[1]
    M = B * S
    out_dtype = x.dtype

    # Optional low-precision compute path (weights/activations); biases and
    # accumulation stay fp32.
    if compute_dtype is not None:
        x = x.astype(compute_dtype)
        w1 = w1.astype(compute_dtype)
        w2 = w2.astype(compute_dtype)
        b1 = b1.astype(jnp.float32)
        b2 = b2.astype(jnp.float32)

    sx = jnp.dtype(x.dtype).itemsize
    sw = jnp.dtype(w1.dtype).itemsize
    sb = jnp.dtype(b1.dtype).itemsize
    so = jnp.dtype(out_dtype).itemsize
    sub = max(8, 32 // sx)                 # sublane packing: 8 fp32 / 16 bf16 / 32 int8

    vmem_cap, n_cores = _tpu_hints()
    budget = max(32 << 20, vmem_cap - (16 << 20))   # leave compiler/internal headroom

    # ---- Hidden tiling ---------------------------------------------------------
    if th is None:
        th = 1024 if budget >= (96 << 20) else 512
    if th >= H:
        th = H                                        # single chunk (fused kernel)
    else:
        th = max(128, (th // 128) * 128)              # lane-aligned hidden chunk

    def working_bytes(tm_, th_, fused_):
        w = (4 * tm_ * D * sx                 # x + out tiles, double-buffered
             + 4 * D * th_ * sw               # W1 + W2 tiles, double-buffered
             + 2 * (th_ + D) * sb             # bias tiles
             + tm_ * th_ * 4)                 # live (tm, th) ReLU intermediate
        if not fused_:
            w += tm_ * D * 4                  # fp32 accumulator scratch
        return w

    # Bound tm by the VMEM budget; shrink th if even tm=128 would not fit.
    while True:
        fused = th >= H
        fixed = working_bytes(0, th, fused) + (2 << 20)
        per_row = working_bytes(1, th, fused) - working_bytes(0, th, fused)
        avail = max(0, budget - fixed)
        tm_cap = max(sub, (avail // per_row) // sub * sub)
        if tm_cap >= 128 or th <= 128 or th >= H:
            break
        th = max(128, (th // 2) // 128 * 128)
    fused = th >= H

    # ---- Row tiling --------------------------------------------------------------
    tm_default = 1024 if budget >= (96 << 20) else 512
    tm_req = tm_default if tm is None else tm
    tm_max = max(sub, (min(tm_req, tm_cap) // sub) * sub)

    weight_stream = (w1.size + w2.size) * sw + (b1.size + b2.size) * sb
    row_stream = D * sx + D * so

    if M <= tm_max:
        if n_cores >= 2 and M >= 2 * sub:
            # >= 2 row tiles so the "parallel" axis shards across v7x's 2 TensorCores.
            tm = _round_up((M + 1) // 2, sub)
        else:
            tm = _round_up(M, sub)
    else:
        cands = sorted({c for c in (128, 256, 512, 1024) if sub <= c <= tm_max}
                       | {tm_max})

        def tile_cost(t):
            m_pad_ = _round_up(M, t)
            return (m_pad_ // t) * weight_stream + m_pad_ * row_stream

        tm = min(cands, key=tile_cost)
    m_pad = _round_up(M, tm)
    n_rows = m_pad // tm

    # ---- Hidden padding (zero-padded columns/rows contribute exactly 0) -----------
    if fused:
        h_pad, n_h = H, 1
    else:
        h_pad = _round_up(H, th)
        n_h = h_pad // th
        if h_pad != H:
            w1 = jnp.pad(w1, ((0, 0), (0, h_pad - H)))
            b1 = jnp.pad(b1, ((0, h_pad - H),))
            w2 = jnp.pad(w2, ((0, h_pad - H), (0, 0)))

    x2 = x.reshape(M, D)
    if m_pad != M:
        x2 = jnp.pad(x2, ((0, m_pad - M), (0, 0)))

    b1_2 = b1.reshape(1, h_pad)
    b2_2 = b2.reshape(1, D)

    if vmem_limit_bytes is None:
        vmem_limit_bytes = int(min(max(working_bytes(tm, th, fused) + (4 << 20),
                                       16 << 20), budget))

    cost = pl.CostEstimate(
        flops=4 * m_pad * D * h_pad,          # two matmuls, 2*M*D*H each
        transcendentals=0,
        bytes_accessed=int(m_pad * D * (sx + so)           # x in + out
                           + n_rows * weight_stream),       # weights streamed per row tile
    )

    if fused:
        grid = (n_rows,)
        in_specs = [
            pl.BlockSpec((tm, D), lambda i: (i, 0)),        # x rows tile
            pl.BlockSpec((D, h_pad), lambda i: (0, 0)),     # W1 (resident)
            pl.BlockSpec((1, h_pad), lambda i: (0, 0)),     # b1
            pl.BlockSpec((h_pad, D), lambda i: (0, 0)),     # W2 (resident)
            pl.BlockSpec((1, D), lambda i: (0, 0)),         # b2
        ]
        out_specs = pl.BlockSpec((tm, D), lambda i: (i, 0))
        scratch = []
        kernel = ffn_kernel_fused
        dims = ("parallel",)
    else:
        grid = (n_rows, n_h)                                # hidden axis innermost
        in_specs = [
            pl.BlockSpec((tm, D), lambda i, k: (i, 0)),     # x rows tile
            pl.BlockSpec((D, th), lambda i, k: (0, k)),     # W1 hidden chunk
            pl.BlockSpec((1, th), lambda i, k: (0, k)),     # b1 hidden chunk
            pl.BlockSpec((th, D), lambda i, k: (k, 0)),     # W2 hidden chunk
            pl.BlockSpec((1, D), lambda i, k: (0, 0)),      # b2
        ]
        out_specs = pl.BlockSpec((tm, D), lambda i, k: (i, 0))
        scratch = [pltpu.VMEM((tm, D), jnp.float32)]
        kernel = ffn_kernel_acc
        dims = ("parallel", "arbitrary")

    out = pl.pallas_call(
        kernel,
        out_shape=jax.ShapeDtypeStruct((m_pad, D), out_dtype),
        grid_spec=pltpu.PrefetchScalarGridSpec(
            num_scalar_prefetch=0,
            grid=grid,
            in_specs=in_specs,
            out_specs=out_specs,
            scratch_shapes=scratch,
        ),
        compiler_params=pltpu.CompilerParams(
            dimension_semantics=dims,
            vmem_limit_bytes=int(vmem_limit_bytes)),
        cost_estimate=cost,
    )(x2, w1, b1_2, w2, b2_2)

    return out[:M].reshape(B, S, D)


def reference(x, w1, b1, w2, b2):
    h = jnp.maximum(jnp.dot(x, w1) + b1, 0.0)
    return jnp.dot(h, w2) + b2


if __name__ == "__main__":
    D = 128                      # embed_dim
    H = 4 * D                    # hidden = 512

    key = jax.random.PRNGKey(0)
    kx, k1, k2, k3, k4, kx2, kx3 = jax.random.split(key, 7)

    # Deterministic init (nn.Linear(embed, 4*embed), nn.Linear(4*embed, embed)),
    # stored pre-transposed as (in, out).
    w1 = jax.random.normal(k1, (D, H), dtype=jnp.float32) * (1.0 / jnp.sqrt(D))
    b1 = jax.random.normal(k2, (H,), dtype=jnp.float32) * 0.01
    w2 = jax.random.normal(k3, (H, D), dtype=jnp.float32) * (1.0 / jnp.sqrt(H))
    b2 = jax.random.normal(k4, (D,), dtype=jnp.float32) * 0.01

    # Case 1: small batch -> fused kernel (single hidden chunk), fp32.
    B, S = 2, 8
    x = jax.random.normal(kx, (B, S, D), dtype=jnp.float32)
    y = feed_forward(x, w1, b1, w2, b2)
    jax.block_until_ready(y)
    y_ref = reference(x, w1, b1, w2, b2)
    assert y.shape == (B, S, D)
    assert jnp.allclose(y, y_ref, atol=1e-3, rtol=1e-3)

    # Case 2: ragged row count (padding path) + tiled hidden axis (accumulation path).
    B2, S2 = 3, 100              # M = 300
    xb = jax.random.normal(kx2, (B2, S2, D), dtype=jnp.float32)
    yb = feed_forward(xb, w1, b1, w2, b2, th=256)
    jax.block_until_ready(yb)
    yb_ref = reference(xb, w1, b1, w2, b2)
    assert yb.shape == (B2, S2, D)
    assert jnp.allclose(yb, yb_ref, atol=1e-3, rtol=1e-3)

    # Case 3: larger M (multiple row tiles) with bf16 compute (fp32 accumulation).
    B3, S3 = 2, 768              # M = 1536
    xc = jax.random.normal(kx3, (B3, S3, D), dtype=jnp.float32)
    yc = feed_forward(xc, w1, b1, w2, b2, compute_dtype=jnp.bfloat16)
    jax.block_until_ready(yc)
    yc_ref = reference(xc, w1, b1, w2, b2)
    assert yc.shape == (B3, S3, D)
    assert jnp.allclose(yc, yc_ref, atol=3e-2, rtol=3e-2)

    print("KERNEL_OK")
</pallas_src>

<mosaic_0001>
module attributes {stable_mosaic.version = 11 : i64} {
  func.func @ffn_kernel_fused(%arg0: i32, %arg1: memref<16x128xf32, #tpu.memory_space<vmem>>, %arg2: memref<128x512xf32, #tpu.memory_space<vmem>>, %arg3: memref<1x512xf32, #tpu.memory_space<vmem>>, %arg4: memref<512x128xf32, #tpu.memory_space<vmem>>, %arg5: memref<1x128xf32, #tpu.memory_space<vmem>>, %arg6: memref<16x128xf32, #tpu.memory_space<vmem>>) attributes {dimension_semantics = [#tpu.dimension_semantics<parallel>], iteration_bounds = array<i64: 1>, scalar_prefetch = 0 : i64, scratch_operands = 0 : i64, tpu.core_type = #tpu.core_type<tc>, window_params = [{transform_indices = @transform_0, window_bounds = array<i64: 16, 128>}, {pipeline_mode = #tpu.pipeline_mode<synchronous>, transform_indices = @transform_1, window_bounds = array<i64: 128, 512>}, {pipeline_mode = #tpu.pipeline_mode<synchronous>, transform_indices = @transform_2, window_bounds = array<i64: 1, 512>}, {pipeline_mode = #tpu.pipeline_mode<synchronous>, transform_indices = @transform_3, window_bounds = array<i64: 512, 128>}, {pipeline_mode = #tpu.pipeline_mode<synchronous>, transform_indices = @transform_4, window_bounds = array<i64: 1, 128>}, {transform_indices = @transform_5, window_bounds = array<i64: 16, 128>}]} {
    %c0 = arith.constant 0 : index
    %c0_0 = arith.constant 0 : index
    %0 = vector.load %arg1[%c0, %c0_0] : memref<16x128xf32, #tpu.memory_space<vmem>>, vector<16x128xf32>
    %c0_1 = arith.constant 0 : index
    %c0_2 = arith.constant 0 : index
    %1 = vector.load %arg2[%c0_1, %c0_2] : memref<128x512xf32, #tpu.memory_space<vmem>>, vector<128x512xf32>
    %cst = arith.constant dense<0.000000e+00> : vector<16x512xf32>
    %2 = tpu.matmul %0, %1, %cst {dimension_numbers = #tpu.dot_dimension_numbers<[1], [0], [0], [1], [0, 0, 1, 1], [], []>} : vector<16x128xf32>, vector<128x512xf32>, vector<16x512xf32> -> vector<16x512xf32>
    %c0_3 = arith.constant 0 : index
    %c0_4 = arith.constant 0 : index
    %3 = vector.load %arg3[%c0_3, %c0_4] : memref<1x512xf32, #tpu.memory_space<vmem>>, vector<1x512xf32>
    %4 = vector.broadcast %3 : vector<1x512xf32> to vector<16x512xf32>
    %5 = arith.addf %2, %4 : vector<16x512xf32>
    %cst_5 = arith.constant 0.000000e+00 : f32
    %6 = vector.broadcast %cst_5 : f32 to vector<16x512xf32>
    %7 = arith.maximumf %5, %6 : vector<16x512xf32>
    %c0_6 = arith.constant 0 : index
    %c0_7 = arith.constant 0 : index
    %8 = vector.load %arg4[%c0_6, %c0_7] : memref<512x128xf32, #tpu.memory_space<vmem>>, vector<512x128xf32>
    %cst_8 = arith.constant dense<0.000000e+00> : vector<16x128xf32>
    %9 = tpu.matmul %7, %8, %cst_8 {dimension_numbers = #tpu.dot_dimension_numbers<[1], [0], [0], [1], [0, 0, 1, 1], [], []>} : vector<16x512xf32>, vector<512x128xf32>, vector<16x128xf32> -> vector<16x128xf32>
    %c0_9 = arith.constant 0 : index
    %c0_10 = arith.constant 0 : index
    %10 = vector.load %arg5[%c0_9, %c0_10] : memref<1x128xf32, #tpu.memory_space<vmem>>, vector<1x128xf32>
    %11 = vector.broadcast %10 : vector<1x128xf32> to vector<16x128xf32>
    %12 = arith.addf %9, %11 : vector<16x128xf32>
    %c0_11 = arith.constant 0 : index
    %c0_12 = arith.constant 0 : index
    %13 = vector.load %arg6[%c0_11, %c0_12] : memref<16x128xf32, #tpu.memory_space<vmem>>, vector<16x128xf32>
    tpu.vector_store %arg6[%c0_11, %c0_12], %12 {strides = array<i32>} : memref<16x128xf32, #tpu.memory_space<vmem>>, vector<16x128xf32>,
    return
  }
  func.func @transform_0(%arg0: i32) -> (i32, i32) {
    %c0_i32 = arith.constant 0 : i32
    %c0_i32_0 = arith.constant 0 : i32
    return %arg0, %c0_i32 : i32, i32
  }
  func.func @transform_1(%arg0: i32) -> (i32, i32) {
    %c0_i32 = arith.constant 0 : i32
    %c0_i32_0 = arith.constant 0 : i32
    %c0_i32_1 = arith.constant 0 : i32
    return %c0_i32, %c0_i32_0 : i32, i32
  }
  func.func @transform_2(%arg0: i32) -> (i32, i32) {
    %c0_i32 = arith.constant 0 : i32
    %c0_i32_0 = arith.constant 0 : i32
    %c0_i32_1 = arith.constant 0 : i32
    return %c0_i32, %c0_i32_0 : i32, i32
  }
  func.func @transform_3(%arg0: i32) -> (i32, i32) {
    %c0_i32 = arith.constant 0 : i32
    %c0_i32_0 = arith.constant 0 : i32
    %c0_i32_1 = arith.constant 0 : i32
    return %c0_i32, %c0_i32_0 : i32, i32
  }
  func.func @transform_4(%arg0: i32) -> (i32, i32) {
    %c0_i32 = arith.constant 0 : i32
    %c0_i32_0 = arith.constant 0 : i32
    %c0_i32_1 = arith.constant 0 : i32
    return %c0_i32, %c0_i32_0 : i32, i32
  }
  func.func @transform_5(%arg0: i32) -> (i32, i32) {
    %c0_i32 = arith.constant 0 : i32
    %c0_i32_0 = arith.constant 0 : i32
    return %arg0, %c0_i32 : i32, i32
  }
}

</mosaic_0001>

<bundles_post_ra>
// kernel: tpu_custom_call.1
= control target key start
LH: loop header
LB: loop body
LE: loop exit
PB: predicated region body
PF: predicated region fallthrough
CT: control target
= control target key end

     0   :  { %10 = vsyncpa [#allocation3], 0  ;;  %s645_s0 = inlined_call_operand.hbm [shape: f32[16,128], index: 0, kind: input, shape index: {}]   ;;  %s646_s1 = inlined_call_operand.hbm [shape: f32[128,512], index: 1, kind: input, shape index: {}]   ;;  %s647_s2 = inlined_call_operand.hbm [shape: f32[1,512], index: 2, kind: input, shape index: {}]   ;;  %s648_s3 = inlined_call_operand.hbm [shape: f32[512,128], index: 3, kind: input, shape index: {}]   ;;  %s649_s4 = inlined_call_operand.vmem [shape: f32[1,128], index: 4, kind: input, shape index: {}]   ;;  %s650_s5 = inlined_call_operand.hbm [shape: f32[16,128], index: 5, kind: output, shape index: {}]  }
   0x1   :  { %11 = vsyncpa [#allocation6], 0 }
   0x2   :  { %12 = vsyncpa [#allocation9], 0  ;;  %s31_s20 = sshll.u32 %s646_s1, 4  ;;  %s32_s20 = int_to_ptr.hbm [resolvable:$true] %s31_s20 }
   0x3   :  { %13 = vsyncpa [#allocation4], 0  ;;  %s579_s21 = smov [#allocation5]   ;;  %s18_s25 = sshll.u32 %s645_s0, 4  ;;  %s19_s25 = int_to_ptr.hbm [resolvable:$true] %s18_s25 }
   0x4   :  { %s33_s22 = sshll.u32 %s579_s21, 4  ;;  %s580_s26 = smov 512   ;;  %s34_s22 = int_to_ptr.vmem [resolvable:$true] %s33_s22 }
   0x5   :  { %s581_s27 = smov 32   ;;  %s582_s28 = smov [#allocation2]  }
   0x6   :  { %39 = dma.hbm_to_vmem [thread:$0]  %s32_s20, 8192, %s34_s22, [#allocation6], %s580_s26, %s580_s26, %s581_s27  }
   0x7   :  { %s20_s29 = sshll.u32 %s582_s28, 4  ;;  %s583_s30 = smov 128   ;;  %s21_s29 = int_to_ptr.vmem [resolvable:$true] %s20_s29 }
   0x8   :  { %s584_s6 = smov 8   ;;  %s45_s8 = sshll.u32 %s647_s2, 4  ;;  %s46_s8 = int_to_ptr.hbm [resolvable:$true] %s45_s8 }
   0x9   :  { %26 = dma.hbm_to_vmem [thread:$0]  %s19_s25, 256, %s21_s29, [#allocation3], %s583_s30, %s583_s30, %s584_s6  }
   0xa   :  { %s585_s9 = smov [#allocation7]   ;;  %s55_s12 = sshll.u32 %s648_s3, 4  ;;  %s56_s12 = int_to_ptr.hbm [resolvable:$true] %s55_s12 }
   0xb   :  { %s47_s0 = sshll.u32 %s585_s9, 4  ;;  %s586_s13 = smov [#allocation8]   ;;  %s48_s0 = int_to_ptr.vmem [resolvable:$true] %s47_s0 }
   0xc   :  { %50 = dma.hbm_to_vmem [thread:$0]  %s46_s8, 64, %s48_s0, [#allocation6]  }
   0xd   :  { %s57_s14 = sshll.u32 %s586_s13, 4  ;;  %s58_s14 = int_to_ptr.vmem [resolvable:$true] %s57_s14 }
   0xe   :  { %63 = dma.hbm_to_vmem [thread:$0]  %s56_s12, 8192, %s58_s14, [#allocation9], %s583_s30, %s583_s30, %s584_s6  }
   0xf   :  { %571 = dma.done.wait [#allocation3], 256  }
  0x10   :  { %572 = vsyncadd [#allocation3], 4294967040 }
  0x11   :  { %573 = dma.done.wait [#allocation6], 8256  }
  0x12   :  { %574 = vsyncadd [#allocation6], 4294959040 }
  0x13   :  { %575 = dma.done.wait [#allocation9], 8192  }
  0x14   :  { %576 = vsyncadd [#allocation9], 4294959104  ;;  %v146_v0 = vld [vmem:[#allocation5 + $0x1f0] sm:$0xff]  ;;  %v147_v2 = vld [vmem:[#allocation5 + $0x1f8] sm:$0xff]  ;;  %s587_s15 = smov [#allocation10]  }
  0x15   :  { %v142_v1 = vld [vmem:[#allocation5 + $0x1d0] sm:$0xff]  ;;  %204 = vmatpush.msra.mxu2 %v146_v0  ;;  %227 = vmatpush.msra.mxu3 %v147_v2  ;;  %v143_v3 = vld [vmem:[#allocation5 + $0x1d8] sm:$0xff]  ;;  %v144_v6 = vld [vmem:[#allocation5 + $0x1e0] sm:$0xff]  ;;  %s424_s16 = sshll.u32 %s587_s15, 4  ;;  %s425_s16 = int_to_ptr.vmem [resolvable:$true] %s424_s16 }
  0x16   :  { %v138_v4 = vld [vmem:[#allocation5 + $0x1b0] sm:$0xff]  ;;  %v139_v5 = vld [vmem:[#allocation5 + $0x1b8] sm:$0xff]  ;;  %v140_v7 = vld [vmem:[#allocation5 + $0x1c0] sm:$0xff]  ;;  %158 = vmatpush.msra.mxu0 %v144_v6 }
  0x17   :  { %205 = vmatpush.msra.mxu2 %v142_v1  ;;  %228 = vmatpush.msra.mxu3 %v143_v3  ;;  %v145_v8 = vld [vmem:[#allocation5 + $0x1e8] sm:$0xff]  ;;  %v134_v9 = vld [vmem:[#allocation5 + $0x190] sm:$0xff]  ;;  %v135_v10 = vld [vmem:[#allocation5 + $0x198] sm:$0xff] }
  0x18   :  { %181 = vmatpush.msra.mxu1 %v145_v8  ;;  %v136_v11 = vld [vmem:[#allocation5 + $0x1a0] sm:$0xff]  ;;  %v141_v12 = vld [vmem:[#allocation5 + $0x1c8] sm:$0xff]  ;;  %v130_v13 = vld [vmem:[#allocation5 + $0x170] sm:$0xff]  ;;  %159 = vmatpush.msra.mxu0 %v140_v7 }
  0x19   :  { %206 = vmatpush.msra.mxu2 %v138_v4  ;;  %229 = vmatpush.msra.mxu3 %v139_v5  ;;  %v131_v14 = vld [vmem:[#allocation5 + $0x178] sm:$0xff]  ;;  %v137_v15 = vld [vmem:[#allocation5 + $0x1a8] sm:$0xff]  ;;  %v132_v16 = vld [vmem:[#allocation5 + $0x180] sm:$0xff] }
  0x1a   :  { %182 = vmatpush.msra.mxu1 %v141_v12  ;;  %v133_v17 = vld [vmem:[#allocation5 + $0x188] sm:$0xff]  ;;  %v126_v18 = vld [vmem:[#allocation5 + $0x150] sm:$0xff]  ;;  %160 = vmatpush.msra.mxu0 %v136_v11  ;;  %v127_v19 = vld [vmem:[#allocation5 + $0x158] sm:$0xff] }
  0x1b   :  { %207 = vmatpush.msra.mxu2 %v134_v9  ;;  %230 = vmatpush.msra.mxu3 %v135_v10  ;;  %v128_v20 = vld [vmem:[#allocation5 + $0x160] sm:$0xff]  ;;  %v129_v21 = vld [vmem:[#allocation5 + $0x168] sm:$0xff]  ;;  %v122_v22 = vld [vmem:[#allocation5 + $0x130] sm:$0xff] }
  0x1c   :  { %183 = vmatpush.msra.mxu1 %v137_v15  ;;  %161 = vmatpush.msra.mxu0 %v132_v16  ;;  %v123_v23 = vld [vmem:[#allocation5 + $0x138] sm:$0xff]  ;;  %v124_v24 = vld [vmem:[#allocation5 + $0x140] sm:$0xff]  ;;  %v125_v25 = vld [vmem:[#allocation5 + $0x148] sm:$0xff] }
  0x1d   :  { %208 = vmatpush.msra.mxu2 %v130_v13  ;;  %231 = vmatpush.msra.mxu3 %v131_v14  ;;  %v118_v26 = vld [vmem:[#allocation5 + $0x110] sm:$0xff]  ;;  %v119_v27 = vld [vmem:[#allocation5 + $0x118] sm:$0xff]  ;;  %v120_v28 = vld [vmem:[#allocation5 + $0x120] sm:$0xff] }
  0x1e   :  { %184 = vmatpush.msra.mxu1 %v133_v17  ;;  %162 = vmatpush.msra.mxu0 %v128_v20  ;;  %v121_v29 = vld [vmem:[#allocation5 + $0x128] sm:$0xff]  ;;  %v114_v30 = vld [vmem:[#allocation5 + $0xf0] sm:$0xff]  ;;  %v115_v31 = vld [vmem:[#allocation5 + $0xf8] sm:$0xff] }
  0x1f   :  { %209 = vmatpush.msra.mxu2 %v126_v18  ;;  %232 = vmatpush.msra.mxu3 %v127_v19  ;;  %v116_v32 = vld [vmem:[#allocation5 + $0x100] sm:$0xff]  ;;  %v117_v33 = vld [vmem:[#allocation5 + $0x108] sm:$0xff]  ;;  %v110_v34 = vld [vmem:[#allocation5 + $0xd0] sm:$0xff] }
  0x20   :  { %185 = vmatpush.msra.mxu1 %v129_v21  ;;  %163 = vmatpush.msra.mxu0 %v124_v24  ;;  %v111_v35 = vld [vmem:[#allocation5 + $0xd8] sm:$0xff]  ;;  %v112_v36 = vld [vmem:[#allocation5 + $0xe0] sm:$0xff]  ;;  %v113_v37 = vld [vmem:[#allocation5 + $0xe8] sm:$0xff] }
  0x21   :  { %210 = vmatpush.msra.mxu2 %v122_v22  ;;  %233 = vmatpush.msra.mxu3 %v123_v23  ;;  %v106_v38 = vld [vmem:[#allocation5 + $0xb0] sm:$0xff]  ;;  %v107_v39 = vld [vmem:[#allocation5 + $0xb8] sm:$0xff]  ;;  %v108_v40 = vld [vmem:[#allocation5 + $0xc0] sm:$0xff] }
  0x22   :  { %186 = vmatpush.msra.mxu1 %v125_v25  ;;  %164 = vmatpush.msra.mxu0 %v120_v28  ;;  %v109_v41 = vld [vmem:[#allocation5 + $0xc8] sm:$0xff]  ;;  %v102_v42 = vld [vmem:[#allocation5 + $0x90] sm:$0xff]  ;;  %v103_v43 = vld [vmem:[#allocation5 + $0x98] sm:$0xff] }
  0x23   :  { %211 = vmatpush.msra.mxu2 %v118_v26  ;;  %234 = vmatpush.msra.mxu3 %v119_v27  ;;  %v104_v44 = vld [vmem:[#allocation5 + $0xa0] sm:$0xff]  ;;  %v105_v45 = vld [vmem:[#allocation5 + $0xa8] sm:$0xff]  ;;  %v98_v46 = vld [vmem:[#allocation5 + $0x70] sm:$0xff] }
  0x24   :  { %187 = vmatpush.msra.mxu1 %v121_v29  ;;  %165 = vmatpush.msra.mxu0 %v116_v32  ;;  %v99_v47 = vld [vmem:[#allocation5 + $0x78] sm:$0xff]  ;;  %v100_v48 = vld [vmem:[#allocation5 + $0x80] sm:$0xff]  ;;  %v101_v49 = vld [vmem:[#allocation5 + $0x88] sm:$0xff] }
  0x25   :  { %212 = vmatpush.msra.mxu2 %v114_v30  ;;  %235 = vmatpush.msra.mxu3 %v115_v31  ;;  %v94_v50 = vld [vmem:[#allocation5 + $0x50] sm:$0xff]  ;;  %v95_v51 = vld [vmem:[#allocation5 + $0x58] sm:$0xff]  ;;  %v96_v52 = vld [vmem:[#allocation5 + $0x60] sm:$0xff] }
  0x26   :  { %188 = vmatpush.msra.mxu1 %v117_v33  ;;  %166 = vmatpush.msra.mxu0 %v112_v36  ;;  %v97_v53 = vld [vmem:[#allocation5 + $0x68] sm:$0xff]  ;;  %v90_v54 = vld [vmem:[#allocation5 + $0x30] sm:$0xff]  ;;  %v91_v55 = vld [vmem:[#allocation5 + $0x38] sm:$0xff] }
  0x27   :  { %213 = vmatpush.msra.mxu2 %v110_v34  ;;  %236 = vmatpush.msra.mxu3 %v111_v35  ;;  %v92_v56 = vld [vmem:[#allocation5 + $0x40] sm:$0xff]  ;;  %v93_v57 = vld [vmem:[#allocation5 + $0x48] sm:$0xff]  ;;  %v86_v58 = vld [vmem:[#allocation5 + $0x10] sm:$0xff] }
  0x28   :  { %189 = vmatpush.msra.mxu1 %v113_v37  ;;  %167 = vmatpush.msra.mxu0 %v108_v40  ;;  %v87_v59 = vld [vmem:[#allocation5 + $0x18] sm:$0xff]  ;;  %v82_v60 = vld [vmem:[#allocation2] sm:$0xff]  ;;  %v88_v61 = vld [vmem:[#allocation5 + $0x20] sm:$0xff] }
  0x29   :  { %214 = vmatpush.msra.mxu2 %v106_v38  ;;  %237 = vmatpush.msra.mxu3 %v107_v39  ;;  %v89_v62 = vld [vmem:[#allocation5 + $0x28] sm:$0xff]  ;;  %v305_v63 = vld [vmem:[#allocation8 + $0x178] sm:$0xff]  ;;  %v304_v4 = vld [vmem:[#allocation8 + $0x170] sm:$0xff] }
  0x2a   :  { %190 = vmatpush.msra.mxu1 %v109_v41  ;;  %168 = vmatpush.msra.mxu0 %v104_v44  ;;  %v321_v0 = vld [vmem:[#allocation8 + $0x1f8] sm:$0xff]  ;;  %v85_v2 = vld [vmem:[#allocation5 + $0x8] sm:$0xff]  ;;  %v320_v6 = vld [vmem:[#allocation8 + $0x1f0] sm:$0xff] }
  0x2b   :  { %215 = vmatpush.msra.mxu2 %v102_v42  ;;  %238 = vmatpush.msra.mxu3 %v103_v43  ;;  %v84_v1 = vld [vmem:[#allocation5] sm:$0xff]  ;;  %v272_v7 = vld [vmem:[#allocation8 + $0x70] sm:$0xff]  ;;  %v303_v8 = vld [vmem:[#allocation8 + $0x168] sm:$0xff] }
  0x2c   :  { %191 = vmatpush.msra.mxu1 %v105_v45  ;;  %169 = vmatpush.msra.mxu0 %v100_v48  ;;  %v273_v3 = vld [vmem:[#allocation8 + $0x78] sm:$0xff]  ;;  %v271_v10 = vld [vmem:[#allocation8 + $0x68] sm:$0xff]  ;;  %v288_v11 = vld [vmem:[#allocation8 + $0xf0] sm:$0xff] }
  0x2d   :  { %216 = vmatpush.msra.mxu2 %v98_v46  ;;  %239 = vmatpush.msra.mxu3 %v99_v47  ;;  %v289_v5 = vld [vmem:[#allocation8 + $0xf8] sm:$0xff]  ;;  %v302_v12 = vld [vmem:[#allocation8 + $0x160] sm:$0xff]  ;;  %v319_v13 = vld [vmem:[#allocation8 + $0x1e8] sm:$0xff] }
  0x2e   :  { %192 = vmatpush.msra.mxu1 %v101_v49  ;;  %170 = vmatpush.msra.mxu0 %v96_v52  ;;  %v83_v9 = vld [vmem:[#allocation2 + $0x8] sm:$0xff]  ;;  %v270_v14 = vld [vmem:[#allocation8 + $0x60] sm:$0xff]  ;;  %v287_v15 = vld [vmem:[#allocation8 + $0xe8] sm:$0xff] }
  0x2f   :  { %217 = vmatpush.msra.mxu2 %v94_v50  ;;  %240 = vmatpush.msra.mxu3 %v95_v51  ;;  %v301_v16 = vld [vmem:[#allocation8 + $0x158] sm:$0xff]  ;;  %v318_v17 = vld [vmem:[#allocation8 + $0x1e0] sm:$0xff]  ;;  %v300_v20 = vld [vmem:[#allocation8 + $0x150] sm:$0xff] }
  0x30   :  { %193 = vmatpush.msra.mxu1 %v97_v53  ;;  %171 = vmatpush.msra.mxu0 %v92_v56  ;;  %v269_v18 = vld [vmem:[#allocation8 + $0x58] sm:$0xff]  ;;  %v286_v19 = vld [vmem:[#allocation8 + $0xe0] sm:$0xff]  ;;  %v268_v22 = vld [vmem:[#allocation8 + $0x50] sm:$0xff] }
  0x31   :  { %218 = vmatpush.msra.mxu2 %v90_v54  ;;  %241 = vmatpush.msra.mxu3 %v91_v55  ;;  %v317_v21 = vld [vmem:[#allocation8 + $0x1d8] sm:$0xff]  ;;  %v299_v24 = vld [vmem:[#allocation8 + $0x148] sm:$0xff]  ;;  %v316_v25 = vld [vmem:[#allocation8 + $0x1d0] sm:$0xff] }
  0x32   :  { %194 = vmatpush.msra.mxu1 %v93_v57  ;;  %172 = vmatpush.msra.mxu0 %v88_v61  ;;  %v285_v23 = vld [vmem:[#allocation8 + $0xd8] sm:$0xff]  ;;  %v267_v26 = vld [vmem:[#allocation8 + $0x48] sm:$0xff]  ;;  %v284_v27 = vld [vmem:[#allocation8 + $0xd0] sm:$0xff] }
  0x33   :  { %219 = vmatpush.msra.mxu2 %v86_v58  ;;  %242 = vmatpush.msra.mxu3 %v87_v59  ;;  %v298_v28 = vld [vmem:[#allocation8 + $0x140] sm:$0xff]  ;;  %v315_v29 = vld [vmem:[#allocation8 + $0x1c8] sm:$0xff]  ;;  %v297_v32 = vld [vmem:[#allocation8 + $0x138] sm:$0xff] }
  0x34   :  { %220 = vmatmul.f32.vlgmr.msra.gmra.mxu2 %v82_v60  ;;  %243 = vmatmul.f32.vlgmr.msra.gmra.mxu3 %v82_v60  ;;  %v266_v30 = vld [vmem:[#allocation8 + $0x40] sm:$0xff]  ;;  %v283_v31 = vld [vmem:[#allocation8 + $0xc8] sm:$0xff]  ;;  %v265_v34 = vld [vmem:[#allocation8 + $0x38] sm:$0xff] }
  0x35   :  { %195 = vmatpush.msra.mxu1 %v89_v62  ;;  %372 = vmatpush.msrb.mxu2 %v305_v63  ;;  %v314_v33 = vld [vmem:[#allocation8 + $0x1c0] sm:$0xff]  ;;  %v296_v36 = vld [vmem:[#allocation8 + $0x130] sm:$0xff]  ;;  %v313_v37 = vld [vmem:[#allocation8 + $0x1b8] sm:$0xff] }
  0x36   :  { %395 = vmatpush.msrb.mxu3 %v321_v0  ;;  %173 = vmatpush.msra.mxu0 %v84_v1  ;;  %v282_v35 = vld [vmem:[#allocation8 + $0xc0] sm:$0xff]  ;;  %v264_v38 = vld [vmem:[#allocation8 + $0x30] sm:$0xff]  ;;  %v281_v39 = vld [vmem:[#allocation8 + $0xb8] sm:$0xff] }
  0x37   :  { %196 = vmatpush.msra.mxu1 %v85_v2  ;;  %174 = vmatmul.f32.vlgmr.msra.gmra.mxu0 %v82_v60  ;;  %v295_v40 = vld [vmem:[#allocation8 + $0x128] sm:$0xff]  ;;  %v312_v41 = vld [vmem:[#allocation8 + $0x1b0] sm:$0xff]  ;;  %v294_v44 = vld [vmem:[#allocation8 + $0x120] sm:$0xff] }
  0x38   :  { %197 = vmatmul.f32.vlgmr.msra.gmra.mxu1 %v82_v60  ;;  %326 = vmatpush.msrb.mxu0 %v273_v3  ;;  %v263_v42 = vld [vmem:[#allocation8 + $0x28] sm:$0xff]  ;;  %v280_v43 = vld [vmem:[#allocation8 + $0xb0] sm:$0xff]  ;;  %v262_v46 = vld [vmem:[#allocation8 + $0x20] sm:$0xff] }
  0x39   :  { %373 = vmatpush.msrb.mxu2 %v304_v4  ;;  %349 = vmatpush.msrb.mxu1 %v289_v5  ;;  %v311_v45 = vld [vmem:[#allocation8 + $0x1a8] sm:$0xff]  ;;  %v293_v48 = vld [vmem:[#allocation8 + $0x118] sm:$0xff]  ;;  %v310_v49 = vld [vmem:[#allocation8 + $0x1a0] sm:$0xff] }
  0x3a   :  { %396 = vmatpush.msrb.mxu3 %v320_v6  ;;  %327 = vmatpush.msrb.mxu0 %v272_v7  ;;  %v279_v47 = vld [vmem:[#allocation8 + $0xa8] sm:$0xff]  ;;  %v261_v50 = vld [vmem:[#allocation8 + $0x18] sm:$0xff]  ;;  %v278_v51 = vld [vmem:[#allocation8 + $0xa0] sm:$0xff] }
  0x3b   :  { %374 = vmatpush.msrb.mxu2 %v303_v8  ;;  %350 = vmatpush.msrb.mxu1 %v288_v11  ;;  %v292_v52 = vld [vmem:[#allocation8 + $0x110] sm:$0xff]  ;;  %v309_v53 = vld [vmem:[#allocation8 + $0x198] sm:$0xff]  ;;  %v291_v56 = vld [vmem:[#allocation8 + $0x108] sm:$0xff] }
  0x3c   :  { %223 = vmatmul.f32.gmra.mxu2 %v83_v9  ;;  %246 = vmatmul.f32.gmra.mxu3 %v83_v9  ;;  %v260_v54 = vld [vmem:[#allocation8 + $0x10] sm:$0xff]  ;;  %v277_v55 = vld [vmem:[#allocation8 + $0x98] sm:$0xff]  ;;  %v259_v58 = vld [vmem:[#allocation8 + $0x8] sm:$0xff] }
  0x3d   :  { %328 = vmatpush.msrb.mxu0 %v271_v10  ;;  %375 = vmatpush.msrb.mxu2 %v302_v12  ;;  %v308_v57 = vld [vmem:[#allocation8 + $0x190] sm:$0xff]  ;;  %v290_v60 = vld [vmem:[#allocation8 + $0x100] sm:$0xff]  ;;  %v307_v61 = vld [vmem:[#allocation8 + $0x188] sm:$0xff] }
  0x3e   :  { %397 = vmatpush.msrb.mxu3 %v319_v13  ;;  %351 = vmatpush.msrb.mxu1 %v287_v15  ;;  %v276_v59 = vld [vmem:[#allocation8 + $0x90] sm:$0xff]  ;;  %v258_v62 = vld [vmem:[#allocation8] sm:$0xff]  ;;  %v275_v63 = vld [vmem:[#allocation8 + $0x88] sm:$0xff] }
  0x3f   :  { %329 = vmatpush.msrb.mxu0 %v270_v14  ;;  %376 = vmatpush.msrb.mxu2 %v301_v16  ;;  %v306_v0 = vld [vmem:[#allocation8 + $0x180] sm:$0xff]  ;;  %v148_v2 = vld [vmem:[#allocation7] sm:$0xf] }
  0x40   :  { %177 = vmatmul.f32.gmra.mxu0 %v83_v9  ;;  %200 = vmatmul.f32.gmra.mxu1 %v83_v9  ;;  %v274_v1 = vld [vmem:[#allocation8 + $0x80] sm:$0xff]  ;;  %v150_v3 = vperm.slane %v148_v2, 0  ;;  %v151_v4 = vperm.slane %v148_v2, 1  ;;  %v152_v5 = vperm.slane %v148_v2, 2  ;;  %v153_v6 = vperm.slane %v148_v2, 3 }
  0x41   :  { %398 = vmatpush.msrb.mxu3 %v318_v17  ;;  %330 = vmatpush.msrb.mxu0 %v269_v18 }
  0x42   :  { %352 = vmatpush.msrb.mxu1 %v286_v19  ;;  %377 = vmatpush.msrb.mxu2 %v300_v20 }
  0x43   :  { %399 = vmatpush.msrb.mxu3 %v317_v21  ;;  %331 = vmatpush.msrb.mxu0 %v268_v22 }
  0x44   :  { %353 = vmatpush.msrb.mxu1 %v285_v23  ;;  %378 = vmatpush.msrb.mxu2 %v299_v24 }
  0x45   :  { %400 = vmatpush.msrb.mxu3 %v316_v25  ;;  %332 = vmatpush.msrb.mxu0 %v267_v26 }
  0x46   :  { %354 = vmatpush.msrb.mxu1 %v284_v27  ;;  %379 = vmatpush.msrb.mxu2 %v298_v28 }
  0x47   :  { %401 = vmatpush.msrb.mxu3 %v315_v29  ;;  %333 = vmatpush.msrb.mxu0 %v266_v30 }
  0x48   :  { %355 = vmatpush.msrb.mxu1 %v283_v31  ;;  %380 = vmatpush.msrb.mxu2 %v297_v32  ;;  %v450_v31 = vld [vmem:[%s649_s4] ss:$0 sm:$0xff]  ;;  %s426_s4 = sshll.u32 %s650_s5, 4  ;;  %s427_s4 = int_to_ptr.hbm [resolvable:$true] %s426_s4 }
  0x49   :  { %402 = vmatpush.msrb.mxu3 %v314_v33  ;;  %334 = vmatpush.msrb.mxu0 %v265_v34 }
  0x4a   :  { %356 = vmatpush.msrb.mxu1 %v282_v35  ;;  %381 = vmatpush.msrb.mxu2 %v296_v36 }
  0x4b   :  { %403 = vmatpush.msrb.mxu3 %v313_v37  ;;  %335 = vmatpush.msrb.mxu0 %v264_v38 }
  0x4c   :  { %357 = vmatpush.msrb.mxu1 %v281_v39  ;;  %382 = vmatpush.msrb.mxu2 %v295_v40 }
  0x4d   :  { %404 = vmatpush.msrb.mxu3 %v312_v41  ;;  %336 = vmatpush.msrb.mxu0 %v263_v42 }
  0x4e   :  { %358 = vmatpush.msrb.mxu1 %v280_v43  ;;  %383 = vmatpush.msrb.mxu2 %v294_v44 }
  0x4f   :  { %405 = vmatpush.msrb.mxu3 %v311_v45  ;;  %337 = vmatpush.msrb.mxu0 %v262_v46 }
  0x50   :  { %359 = vmatpush.msrb.mxu1 %v279_v47  ;;  %384 = vmatpush.msrb.mxu2 %v293_v48 }
  0x51   :  { %406 = vmatpush.msrb.mxu3 %v310_v49  ;;  %338 = vmatpush.msrb.mxu0 %v261_v50 }
  0x52   :  { %360 = vmatpush.msrb.mxu1 %v278_v51  ;;  %385 = vmatpush.msrb.mxu2 %v292_v52 }
  0x53   :  { %407 = vmatpush.msrb.mxu3 %v309_v53  ;;  %339 = vmatpush.msrb.mxu0 %v260_v54 }
  0x54   :  { %361 = vmatpush.msrb.mxu1 %v277_v55  ;;  %386 = vmatpush.msrb.mxu2 %v291_v56 }
  0x55   :  { %408 = vmatpush.msrb.mxu3 %v308_v57  ;;  %340 = vmatpush.msrb.mxu0 %v259_v58 }
  0x56   :  { %362 = vmatpush.msrb.mxu1 %v276_v59  ;;  %387 = vmatpush.msrb.mxu2 %v290_v60 }
  0x57   :  { %409 = vmatpush.msrb.mxu3 %v307_v61  ;;  %341 = vmatpush.msrb.mxu0 %v258_v62 }
  0x58   :  { %363 = vmatpush.msrb.mxu1 %v275_v63 }
  0x59   :  { %410 = vmatpush.msrb.mxu3 %v306_v0 }
  0x5a   :  { %364 = vmatpush.msrb.mxu1 %v274_v1 }
  0xb4   :  { %v175_v7 = vpop.f32.mrf.mxu0 }
  0xb5   :  { %v198_v8 = vpop.f32.mrf.mxu1  ;;  %v176_v9 = vadd.f32 %v175_v7, %v150_v3 }
  0xb6   :  { %v199_v10 = vadd.f32 %v198_v8, %v151_v4 }
  0xb7   :  { %v221_v11 = vpop.f32.mrf.mxu2  ;;  %v244_v12 = vpop.f32.mrf.mxu3  ;;  %v250_v14 = vmax.f32 %v176_v9, 0.0 }
  0xb8   :  { %v222_v13 = vadd.f32 %v221_v11, %v152_v5  ;;  %v245_v15 = vadd.f32 %v244_v12, %v153_v6  ;;  %v251_v16 = vmax.f32 %v199_v10, 0.0 }
  0xb9   :  { %342 = vmatmul.f32.vlgmr.msrb.gmra.mxu0 %v250_v14 }
  0xba   :  { %v252_v17 = vmax.f32 %v222_v13, 0.0  ;;  %v253_v18 = vmax.f32 %v245_v15, 0.0  ;;  %365 = vmatmul.f32.vlgmr.msrb.gmra.mxu1 %v251_v16 }
  0xbc   :  { %388 = vmatmul.f32.vlgmr.msrb.gmra.mxu2 %v252_v17  ;;  %411 = vmatmul.f32.vlgmr.msrb.gmra.mxu3 %v253_v18 }
  0xbd   :  { %v178_v19 = vpop.f32.mrf.mxu0  ;;  %v201_v20 = vpop.f32.mrf.mxu1 }
  0xbe   :  { %v179_v21 = vadd.f32 %v178_v19, %v150_v3  ;;  %v202_v22 = vadd.f32 %v201_v20, %v151_v4 }
  0xbf   :  { %v224_v23 = vpop.f32.mrf.mxu2  ;;  %v247_v24 = vpop.f32.mrf.mxu3 }
  0xc0   :  { %v225_v25 = vadd.f32 %v224_v23, %v152_v5  ;;  %v254_v26 = vmax.f32 %v179_v21, 0.0  ;;  %v248_v27 = vadd.f32 %v247_v24, %v153_v6  ;;  %v255_v28 = vmax.f32 %v202_v22, 0.0 }
  0xc2   :  { %v256_v29 = vmax.f32 %v225_v25, 0.0  ;;  %v257_v30 = vmax.f32 %v248_v27, 0.0  ;;  %345 = vmatmul.f32.gmra.mxu0 %v254_v26  ;;  %368 = vmatmul.f32.gmra.mxu1 %v255_v28 }
  0xc4   :  { %391 = vmatmul.f32.gmra.mxu2 %v256_v29  ;;  %414 = vmatmul.f32.gmra.mxu3 %v257_v30 }
 0x136   :  { %v343_v32 = vpop.f32.mrf.mxu0 }
 0x137   :  { %v366_v33 = vpop.f32.mrf.mxu1  ;;  %v344_v34 = vadd.f32 %v450_v31, %v343_v32 }
 0x139   :  { %v367_v35 = vadd.f32 %v366_v33, %v344_v34 }
 0x13f   :  { %v389_v36 = vpop.f32.mrf.mxu2  ;;  %v412_v37 = vpop.f32.mrf.mxu3 }
 0x140   :  { %v390_v38 = vadd.f32 %v389_v36, %v367_v35  ;;  %v346_v39 = vpop.f32.mrf.mxu0  ;;  %v369_v41 = vpop.f32.mrf.mxu1 }
 0x141   :  { %v347_v40 = vadd.f32 %v450_v31, %v346_v39 }
 0x142   :  { %v413_v42 = vadd.f32 %v412_v37, %v390_v38 }
 0x143   :  { %v370_v43 = vadd.f32 %v369_v41, %v347_v40 }
 0x144   :  { %418 = vst [vmem:[#allocation10] sm:$0xff] %v413_v42 }
 0x147   :  { %v392_v44 = vpop.f32.mrf.mxu2  ;;  %v415_v45 = vpop.f32.mrf.mxu3 }
 0x148   :  { %v393_v46 = vadd.f32 %v392_v44, %v370_v43 }
 0x14a   :  { %v416_v47 = vadd.f32 %v415_v45, %v393_v46 }
 0x14c   :  { %419 = vst [vmem:[#allocation10 + $0x8] sm:$0xff] %v416_v47 }
 0x14d   :  { %432 = dma.vmem_to_hbm [thread:$0]  %s425_s16, 256, %s427_s4, [#allocation4], %s583_s30, %s583_s30, %s584_s6  }
 0x14e   :  { %577 = dma.done.wait [#allocation4], 256  }
 0x14f   :  { %578 = vsyncadd [#allocation4], 4294967040 }
 0x150   :  { %437 = vsyncpa [#allocation3], 1 }
 0x151   :  { %438 = vsyncpa [#allocation6], 1 }
 0x152   :  { %439 = vsyncpa [#allocation9], 1 }
 0x153   :  { %440 = vsyncpa [#allocation4], 1 }

</bundles_post_ra>
